<compile_context>
chip_gen: v7x
topology: tpu7x:2x2x1
jax: 0.10.0
libtpu: 0.0.40
codegen_flags: <defaults>
</compile_context>

<pallas_src>
import jax
import jax.numpy as jnp
from jax.experimental import pallas as pl
from jax.experimental.pallas import tpu as pltpu

LANE = 128


def _make_kernel(cout, cin, chunk):
    """Kernel over dense (Cin, S, 128) -> (Cout, S, 128) slabs."""

    def kernel(w_ref, x_ref, o_ref):
        # w_ref: (Cout, Cin)     f32 in SMEM -> scalar broadcast factors (no MXU, C is tiny)
        # x_ref: (Cin,  S, 128)  f32 in VMEM -> x_ref[ci, rows, :] is a dense sub-slab
        # o_ref: (Cout, S, 128)  f32 in VMEM -> dense, unmasked full-width stores
        w = [[w_ref[co, ci] for ci in range(cin)] for co in range(cout)]
        n_chunks = x_ref.shape[1] // chunk

        def compute(r0):
            # Per-channel MACs on a (chunk, 128) sub-slab: bounded vreg live ranges.
            for co in range(cout):
                acc = x_ref[0, pl.ds(r0, chunk), :] * w[co][0]
                for ci in range(1, cin):
                    acc = acc + x_ref[ci, pl.ds(r0, chunk), :] * w[co][ci]
                o_ref[co, pl.ds(r0, chunk), :] = jnp.maximum(acc - 0.5, 0.0).astype(o_ref.dtype)

        if n_chunks == 1:
            compute(0)
        else:
            @pl.loop(0, n_chunks)
            def _(k):
                compute(pl.multiple_of(k * chunk, chunk))

    return kernel


def _pick_tiles(s_total, n_batch, cap_rows=1024):
    """Pick (S, chunk): 128-lane rows per grid step, and the in-kernel sub-chunk size."""
    divs = [d for d in range(8, min(s_total, cap_rows) + 1, 8) if s_total % d == 0]
    s = None
    for d in reversed(divs):
        # Keep >= 2 parallel grid steps for single-image inputs (both v7x TensorCores get work).
        if n_batch > 1 or s_total // d >= 2:
            s = d
            break
    if s is None:
        s = divs[-1] if divs else s_total  # full extent is always a legal block dim
    chunk = s
    for c in (64, 56, 48, 40, 32, 24, 16, 8):
        if s % c == 0:
            chunk = c
            break
    return s, chunk


def model_forward(x, w):
    """x: (N, Cin, H, W) f32, w: (Cout, Cin, 1, 1) f32 -> relu(conv1x1_pad1(x) - 0.5)."""
    N, Cin, H, W = x.shape
    Cout = w.shape[0]
    HW = H * W

    # Lane- and sublane-dense view of the activations: (N, Cin, HW/128, 128).
    hw_pad = -(-HW // LANE) * LANE
    xf = x.reshape(N, Cin, HW)
    if hw_pad != HW:
        # Rare fallback (HW not a multiple of 128): pad the flat spatial axis; the extra
        # positions are computed (relu(0-0.5)=0) and sliced off below.
        xf = jnp.pad(xf, ((0, 0), (0, 0), (0, hw_pad - HW)))
    s_total = hw_pad // LANE
    xm = xf.reshape(N, Cin, s_total, LANE)
    wm = w.reshape(Cout, Cin).astype(jnp.float32)

    S, chunk = _pick_tiles(s_total, N)
    grid = (N, s_total // S)

    interior = pl.pallas_call(
        _make_kernel(Cout, Cin, chunk),
        out_shape=jax.ShapeDtypeStruct((N, Cout, s_total, LANE), x.dtype),
        grid=grid,
        in_specs=[
            # Tiny weight resident in SMEM, read as scalars (no MXU).
            pl.BlockSpec(memory_space=pltpu.MemorySpace.SMEM),
            # Dense (Cin, S, 128) activation tiles.
            pl.BlockSpec((None, Cin, S, LANE), lambda n, j: (n, 0, j, 0)),
        ],
        out_specs=pl.BlockSpec((None, Cout, S, LANE), lambda n, j: (n, 0, j, 0)),
        compiler_params=pltpu.CompilerParams(
            dimension_semantics=("parallel", "parallel"),
        ),
    )(wm, xm)

    out = interior.reshape(N, Cout, hw_pad)
    if hw_pad != HW:
        out = out[:, :, :HW]
    out = out.reshape(N, Cout, H, W)

    # padding=1 border of the conv output: with bias=False it equals relu(0 - 0.5) == 0.
    # TODO(synk): for shapes where (W+2) is near a multiple of 128 it would pay to fuse this pad
    # into the kernel's output layout and save one full HBM pass.
    return jnp.pad(out, ((0, 0), (0, 0), (1, 1), (1, 1)))


def _reference(x, w):
    xp = jnp.pad(x, ((0, 0), (0, 0), (1, 1), (1, 1)))
    c_out, c_in = w.shape[0], w.shape[1]
    ref = jnp.einsum("nchw,oc->nohw", xp, w.reshape(c_out, c_in),
                     precision=jax.lax.Precision.HIGHEST)
    return jnp.maximum(ref - 0.5, 0.0)


if __name__ == "__main__":
    key = jax.random.PRNGKey(0)

    # Shapes consistent with the module: Conv2d(3 -> 3, 1x1, padding=1, bias=False).
    # (2,3,16,16): small primary case; (1,3,64,64): the spec's shape (exercises the >=2-step
    # parallel grid); (2,3,128,128): exercises the in-kernel pl.loop chunking path.
    for (n, c, h, wdim) in [(2, 3, 16, 16), (1, 3, 64, 64), (2, 3, 128, 128)]:
        key, kx, kw = jax.random.split(key, 3)
        x = jax.random.normal(kx, (n, c, h, wdim), dtype=jnp.float32)
        w = jax.random.normal(kw, (c, c, 1, 1), dtype=jnp.float32)

        out = jax.block_until_ready(model_forward(x, w))
        ref = _reference(x, w)

        assert out.shape == (n, c, h + 2, wdim + 2), out.shape
        assert jnp.allclose(out, ref, atol=1e-5, rtol=1e-5)

    print("KERNEL_OK")
</pallas_src>

<mosaic_0001>
module attributes {stable_mosaic.version = 11 : i64} {
  func.func @kernel(%arg0: i32, %arg1: i32, %arg2: memref<3x3xf32, #tpu.memory_space<smem>>, %arg3: memref<1x3x2x128xf32, #tpu.memory_space<vmem>>, %arg4: memref<1x3x2x128xf32, #tpu.memory_space<vmem>>) attributes {dimension_semantics = [#tpu.dimension_semantics<parallel>, #tpu.dimension_semantics<parallel>], iteration_bounds = array<i64: 2, 1>, scalar_prefetch = 0 : i64, scratch_operands = 0 : i64, tpu.core_type = #tpu.core_type<tc>, window_params = [{transform_indices = @transform_0, window_bounds = array<i64: 3, 3>}, {transform_indices = @transform_1, window_bounds = array<i64: 1, 3, 2, 128>}, {transform_indices = @transform_2, window_bounds = array<i64: 1, 3, 2, 128>}]} {
    %c0 = arith.constant 0 : index
    %c0_0 = arith.constant 0 : index
    %0 = memref.load %arg2[%c0, %c0_0] : memref<3x3xf32, #tpu.memory_space<smem>>
    %c0_1 = arith.constant 0 : index
    %c1 = arith.constant 1 : index
    %1 = memref.load %arg2[%c0_1, %c1] : memref<3x3xf32, #tpu.memory_space<smem>>
    %c0_2 = arith.constant 0 : index
    %c2 = arith.constant 2 : index
    %2 = memref.load %arg2[%c0_2, %c2] : memref<3x3xf32, #tpu.memory_space<smem>>
    %c1_3 = arith.constant 1 : index
    %c0_4 = arith.constant 0 : index
    %3 = memref.load %arg2[%c1_3, %c0_4] : memref<3x3xf32, #tpu.memory_space<smem>>
    %c1_5 = arith.constant 1 : index
    %c1_6 = arith.constant 1 : index
    %4 = memref.load %arg2[%c1_5, %c1_6] : memref<3x3xf32, #tpu.memory_space<smem>>
    %c1_7 = arith.constant 1 : index
    %c2_8 = arith.constant 2 : index
    %5 = memref.load %arg2[%c1_7, %c2_8] : memref<3x3xf32, #tpu.memory_space<smem>>
    %c2_9 = arith.constant 2 : index
    %c0_10 = arith.constant 0 : index
    %6 = memref.load %arg2[%c2_9, %c0_10] : memref<3x3xf32, #tpu.memory_space<smem>>
    %c2_11 = arith.constant 2 : index
    %c1_12 = arith.constant 1 : index
    %7 = memref.load %arg2[%c2_11, %c1_12] : memref<3x3xf32, #tpu.memory_space<smem>>
    %c2_13 = arith.constant 2 : index
    %c2_14 = arith.constant 2 : index
    %8 = memref.load %arg2[%c2_13, %c2_14] : memref<3x3xf32, #tpu.memory_space<smem>>
    %c0_15 = arith.constant 0 : index
    %c0_16 = arith.constant 0 : index
    %c0_17 = arith.constant 0 : index
    %c0_18 = arith.constant 0 : index
    %9 = vector.load %arg3[%c0_15, %c0_16, %c0_17, %c0_18] : memref<1x3x2x128xf32, #tpu.memory_space<vmem>>, vector<1x1x2x128xf32>
    %10 = vector.shape_cast %9 : vector<1x1x2x128xf32> to vector<2x128xf32>
    %11 = vector.broadcast %0 : f32 to vector<2x128xf32>
    %12 = arith.mulf %10, %11 : vector<2x128xf32>
    %c0_19 = arith.constant 0 : index
    %c1_20 = arith.constant 1 : index
    %c0_21 = arith.constant 0 : index
    %c0_22 = arith.constant 0 : index
    %13 = vector.load %arg3[%c0_19, %c1_20, %c0_21, %c0_22] : memref<1x3x2x128xf32, #tpu.memory_space<vmem>>, vector<1x1x2x128xf32>
    %14 = vector.shape_cast %13 : vector<1x1x2x128xf32> to vector<2x128xf32>
    %15 = vector.broadcast %1 : f32 to vector<2x128xf32>
    %16 = arith.mulf %14, %15 : vector<2x128xf32>
    %17 = arith.addf %12, %16 : vector<2x128xf32>
    %c0_23 = arith.constant 0 : index
    %c2_24 = arith.constant 2 : index
    %c0_25 = arith.constant 0 : index
    %c0_26 = arith.constant 0 : index
    %18 = vector.load %arg3[%c0_23, %c2_24, %c0_25, %c0_26] : memref<1x3x2x128xf32, #tpu.memory_space<vmem>>, vector<1x1x2x128xf32>
    %19 = vector.shape_cast %18 : vector<1x1x2x128xf32> to vector<2x128xf32>
    %20 = vector.broadcast %2 : f32 to vector<2x128xf32>
    %21 = arith.mulf %19, %20 : vector<2x128xf32>
    %22 = arith.addf %17, %21 : vector<2x128xf32>
    %cst = arith.constant 5.000000e-01 : f32
    %23 = vector.broadcast %cst : f32 to vector<2x128xf32>
    %24 = arith.subf %22, %23 : vector<2x128xf32>
    %cst_27 = arith.constant 0.000000e+00 : f32
    %25 = vector.broadcast %cst_27 : f32 to vector<2x128xf32>
    %26 = arith.maximumf %24, %25 : vector<2x128xf32>
    %c0_28 = arith.constant 0 : index
    %c0_29 = arith.constant 0 : index
    %c0_30 = arith.constant 0 : index
    %c0_31 = arith.constant 0 : index
    %27 = vector.load %arg4[%c0_28, %c0_29, %c0_30, %c0_31] : memref<1x3x2x128xf32, #tpu.memory_space<vmem>>, vector<1x1x2x128xf32>
    %28 = vector.shape_cast %27 : vector<1x1x2x128xf32> to vector<2x128xf32>
    %29 = vector.shape_cast %26 : vector<2x128xf32> to vector<1x1x2x128xf32>
    tpu.vector_store %arg4[%c0_28, %c0_29, %c0_30, %c0_31], %29 {strides = array<i32>} : memref<1x3x2x128xf32, #tpu.memory_space<vmem>>, vector<1x1x2x128xf32>,
    %c0_32 = arith.constant 0 : index
    %c0_33 = arith.constant 0 : index
    %c0_34 = arith.constant 0 : index
    %c0_35 = arith.constant 0 : index
    %30 = vector.load %arg3[%c0_32, %c0_33, %c0_34, %c0_35] : memref<1x3x2x128xf32, #tpu.memory_space<vmem>>, vector<1x1x2x128xf32>
    %31 = vector.shape_cast %30 : vector<1x1x2x128xf32> to vector<2x128xf32>
    %32 = vector.broadcast %3 : f32 to vector<2x128xf32>
    %33 = arith.mulf %31, %32 : vector<2x128xf32>
    %c0_36 = arith.constant 0 : index
    %c1_37 = arith.constant 1 : index
    %c0_38 = arith.constant 0 : index
    %c0_39 = arith.constant 0 : index
    %34 = vector.load %arg3[%c0_36, %c1_37, %c0_38, %c0_39] : memref<1x3x2x128xf32, #tpu.memory_space<vmem>>, vector<1x1x2x128xf32>
    %35 = vector.shape_cast %34 : vector<1x1x2x128xf32> to vector<2x128xf32>
    %36 = vector.broadcast %4 : f32 to vector<2x128xf32>
    %37 = arith.mulf %35, %36 : vector<2x128xf32>
    %38 = arith.addf %33, %37 : vector<2x128xf32>
    %c0_40 = arith.constant 0 : index
    %c2_41 = arith.constant 2 : index
    %c0_42 = arith.constant 0 : index
    %c0_43 = arith.constant 0 : index
    %39 = vector.load %arg3[%c0_40, %c2_41, %c0_42, %c0_43] : memref<1x3x2x128xf32, #tpu.memory_space<vmem>>, vector<1x1x2x128xf32>
    %40 = vector.shape_cast %39 : vector<1x1x2x128xf32> to vector<2x128xf32>
    %41 = vector.broadcast %5 : f32 to vector<2x128xf32>
    %42 = arith.mulf %40, %41 : vector<2x128xf32>
    %43 = arith.addf %38, %42 : vector<2x128xf32>
    %cst_44 = arith.constant 5.000000e-01 : f32
    %44 = vector.broadcast %cst_44 : f32 to vector<2x128xf32>
    %45 = arith.subf %43, %44 : vector<2x128xf32>
    %cst_45 = arith.constant 0.000000e+00 : f32
    %46 = vector.broadcast %cst_45 : f32 to vector<2x128xf32>
    %47 = arith.maximumf %45, %46 : vector<2x128xf32>
    %c0_46 = arith.constant 0 : index
    %c1_47 = arith.constant 1 : index
    %c0_48 = arith.constant 0 : index
    %c0_49 = arith.constant 0 : index
    %48 = vector.load %arg4[%c0_46, %c1_47, %c0_48, %c0_49] : memref<1x3x2x128xf32, #tpu.memory_space<vmem>>, vector<1x1x2x128xf32>
    %49 = vector.shape_cast %48 : vector<1x1x2x128xf32> to vector<2x128xf32>
    %50 = vector.shape_cast %47 : vector<2x128xf32> to vector<1x1x2x128xf32>
    tpu.vector_store %arg4[%c0_46, %c1_47, %c0_48, %c0_49], %50 {strides = array<i32>} : memref<1x3x2x128xf32, #tpu.memory_space<vmem>>, vector<1x1x2x128xf32>,
    %c0_50 = arith.constant 0 : index
    %c0_51 = arith.constant 0 : index
    %c0_52 = arith.constant 0 : index
    %c0_53 = arith.constant 0 : index
    %51 = vector.load %arg3[%c0_50, %c0_51, %c0_52, %c0_53] : memref<1x3x2x128xf32, #tpu.memory_space<vmem>>, vector<1x1x2x128xf32>
    %52 = vector.shape_cast %51 : vector<1x1x2x128xf32> to vector<2x128xf32>
    %53 = vector.broadcast %6 : f32 to vector<2x128xf32>
    %54 = arith.mulf %52, %53 : vector<2x128xf32>
    %c0_54 = arith.constant 0 : index
    %c1_55 = arith.constant 1 : index
    %c0_56 = arith.constant 0 : index
    %c0_57 = arith.constant 0 : index
    %55 = vector.load %arg3[%c0_54, %c1_55, %c0_56, %c0_57] : memref<1x3x2x128xf32, #tpu.memory_space<vmem>>, vector<1x1x2x128xf32>
    %56 = vector.shape_cast %55 : vector<1x1x2x128xf32> to vector<2x128xf32>
    %57 = vector.broadcast %7 : f32 to vector<2x128xf32>
    %58 = arith.mulf %56, %57 : vector<2x128xf32>
    %59 = arith.addf %54, %58 : vector<2x128xf32>
    %c0_58 = arith.constant 0 : index
    %c2_59 = arith.constant 2 : index
    %c0_60 = arith.constant 0 : index
    %c0_61 = arith.constant 0 : index
    %60 = vector.load %arg3[%c0_58, %c2_59, %c0_60, %c0_61] : memref<1x3x2x128xf32, #tpu.memory_space<vmem>>, vector<1x1x2x128xf32>
    %61 = vector.shape_cast %60 : vector<1x1x2x128xf32> to vector<2x128xf32>
    %62 = vector.broadcast %8 : f32 to vector<2x128xf32>
    %63 = arith.mulf %61, %62 : vector<2x128xf32>
    %64 = arith.addf %59, %63 : vector<2x128xf32>
    %cst_62 = arith.constant 5.000000e-01 : f32
    %65 = vector.broadcast %cst_62 : f32 to vector<2x128xf32>
    %66 = arith.subf %64, %65 : vector<2x128xf32>
    %cst_63 = arith.constant 0.000000e+00 : f32
    %67 = vector.broadcast %cst_63 : f32 to vector<2x128xf32>
    %68 = arith.maximumf %66, %67 : vector<2x128xf32>
    %c0_64 = arith.constant 0 : index
    %c2_65 = arith.constant 2 : index
    %c0_66 = arith.constant 0 : index
    %c0_67 = arith.constant 0 : index
    %69 = vector.load %arg4[%c0_64, %c2_65, %c0_66, %c0_67] : memref<1x3x2x128xf32, #tpu.memory_space<vmem>>, vector<1x1x2x128xf32>
    %70 = vector.shape_cast %69 : vector<1x1x2x128xf32> to vector<2x128xf32>
    %71 = vector.shape_cast %68 : vector<2x128xf32> to vector<1x1x2x128xf32>
    tpu.vector_store %arg4[%c0_64, %c2_65, %c0_66, %c0_67], %71 {strides = array<i32>} : memref<1x3x2x128xf32, #tpu.memory_space<vmem>>, vector<1x1x2x128xf32>,
    return
  }
  func.func @transform_0(%arg0: i32, %arg1: i32) -> (i32, i32) {
    %c0_i32 = arith.constant 0 : i32
    %c0_i32_0 = arith.constant 0 : i32
    %c0_i32_1 = arith.constant 0 : i32
    return %c0_i32, %c0_i32_0 : i32, i32
  }
  func.func @transform_1(%arg0: i32, %arg1: i32) -> (i32, i32, i32, i32) {
    %c0_i32 = arith.constant 0 : i32
    %c0_i32_0 = arith.constant 0 : i32
    %c0_i32_1 = arith.constant 0 : i32
    return %arg0, %c0_i32, %arg1, %c0_i32_0 : i32, i32, i32, i32
  }
  func.func @transform_2(%arg0: i32, %arg1: i32) -> (i32, i32, i32, i32) {
    %c0_i32 = arith.constant 0 : i32
    %c0_i32_0 = arith.constant 0 : i32
    %c0_i32_1 = arith.constant 0 : i32
    return %arg0, %c0_i32, %arg1, %c0_i32_0 : i32, i32, i32, i32
  }
}

</mosaic_0001>

<bundles_post_ra>
// kernel: tpu_custom_call.1
= control target key start
LH: loop header
LB: loop body
LE: loop exit
PB: predicated region body
PF: predicated region fallthrough
CT: control target
= control target key end

     0   :  { %7 = vsyncpa [#allocation5], 0  ;;  %s827_s0 = inlined_call_operand.hbm [shape: f32[3,3], index: 0, kind: input, shape index: {}]   ;;  %s828_s1 = inlined_call_operand.hbm [shape: f32[2,3,2,128], index: 1, kind: input, shape index: {}]   ;;  %s829_s2 = inlined_call_operand.hbm [shape: f32[2,3,2,128], index: 2, kind: output, shape index: {}]  }
   0x1   :  { %8 = vsyncpa [#allocation3], 0 }
   0x2   :  { %10 = vsyncpa [#allocation3 + $0x1], 0 }
   0x3   :  { %11 = vsyncpa [#allocation4], 0 }
   0x4   :  { %13 = vsyncpa [#allocation4 + $0x1], 0  ;;  %s622_s9 = smov 0   ;;  %s624_s10 = smov 0  }
   0x5   :  { %s626_s11 = smov 0   ;;  %s628_s12 = smov 0  }
   0x6   :  { %s630_s13 = smov 0   ;;  %s632_s14 = smov 0  }
   0x7 LB: > { %s358_s15 = sadd.s32 4294967295, %s598_s14   ;;  %s359_s16 = sadd.s32 4294967294, %s598_s14   ;;  %s598_s14 = sphi %s632_s14, %s19_s14   ;;  %s594_s13 = sphi %s630_s13, %s849_s13   ;;  %s590_s12 = sphi %s628_s12, %s848_s12   ;;  %s586_s11 = sphi %s626_s11, %s847_s11   ;;  %s582_s10 = sphi %s624_s10, %s846_s10   ;;  %s578_s9 = sphi %s622_s9, %s845_s9  }
   0x8   : > { %s61_s17 = sadd.s32 1, %s586_s11  ;;  %p68_p0 = scmp.ne.s32.totalorder %s586_s11, %s582_s10 }
   0x9   : > { %p69_p1 = scmp.eq.s32.totalorder %s598_s14, 0  ;;  %p74_p2 = scmp.ne.s32.totalorder %s582_s10, %s578_s9 }
   0xa   : > { %p660_p3 = scmp.eq.s32.totalorder %s358_s15, 0  ;;  %p100_p4 = scmp.eq.s32.totalorder %s358_s15, 1 }
   0xb   : > { %p70_p5 = por %p69_p1, %p68_p0  ;;  %p106_p6 = scmp.eq.s32.totalorder %s359_s16, 1 }
   0xc   : > { %s834_s18 = scalar_select %p660_p3, 1, 0 }
   0xd   : > { %p666_p7 = por %p660_p3, %p74_p2  ;;  %p670_p8 = por %p100_p4, %p68_p0 }
   0xe   : > { %p674_p9 = por %p106_p6, %p74_p2  ;;  %p360_p10 = scmp.ge.s32.totalorder %s598_s14, 1 }
   0xf   : > { %s835_s19 = scalar_select %p666_p7, 1, 0 }
  0x10   : > { %s836_s20 = scalar_select %p670_p8, 1, 0 }
  0x11   : > { %s837_s21 = scalar_select %p674_p9, 1, 0 }
  0x12   : > { %p113_p11 = scmp.lt.s32.totalorder %s598_s14, 3  ;;  %p413_p1 = scmp.lt.s32.totalorder %s598_s14, 2 }
  0x13   : > { %s135_s23 = sand.u32 1, %s586_s11   ;;  %s31_s25 = sadd.s32 1, %s594_s13 }
  0x14   : > { %p681_p13 = pnand %p360_p10, %p113_p11  ;;  %p689_p0 = pnand %p413_p1, %p70_p5 }
  0x15   : > { %s388_s26 = smul.u32 6, %s135_s23  ;;  %p33_p4 = scmp.ge.s32.totalorder %s31_s25, 2 }
  0x16   : > { %p400_p7 = pneg %p681_p13  ;;  %s469_s29 = scalar_lea.hbm %s827_s0, 64 }
  0x17   : > { %p470_p6 = scmp.ne.s32.totalorder %s827_s0, %s469_s29  ;;  %p476_p5 = scmp.lt.u32.totalorder %s469_s29, %s827_s0 }
  0x18   : > { %p401_p2 = pnand %p400_p7, %p660_p3 }
  0x1a   : > { %p471_p10 = pneg %p401_p2 }
  0x1c   : > { %p472_p11 = pnand %p471_p10, %p470_p6 }
  0x1e   : > { %p473_p12 = pneg %p472_p11 }
  0x20   : > { %p478_p1 = pnand %p476_p5, %p473_p12 }
  0x22   : > { %481 = shalt.err (!%p478_p1)
}
  0x23   : > { %s600_s6 = smov [#allocation2]   ;;  %s851_s25 = smov (%p33_p4, %s31_s25), 0 }
  0x24   : > { %403 = dma.hbm_to_smem (!%p401_p2), %s827_s0, 64, %s600_s6, [#allocation5]  }
  0x25   : > { %s389_s15 = smul.u32 96, %s594_s13  ;;  %s56_s16 = ssub.s32 %s594_s13, %s851_s25 }
  0x26   : > { %s139_s27 = scalar_lea.vmem [#allocation6], %s388_s26  ;;  %p59_p7 = scmp.eq.s32.totalorder %s56_s16, 0 }
  0x27   : > { %s147_s28 = sshll.u32 %s139_s27, 4  ;;  %s716_s3 = scalar_lea.hbm %s828_s1, %s389_s15  ;;  %s718_s28 = int_to_ptr.vmem [resolvable:$true] %s147_s28 }
  0x28   : > { %s723_s4 = scalar_select %p59_p7, %s586_s11, %s61_s17  }
  0x29   : > { %s725_s5 = scalar_lea.sflag [#allocation3], %s135_s23  ;;  %s482_s6 = scalar_lea.hbm %s716_s3, 96 }
  0x2a   : > { %p483_p12 = scmp.ne.s32.totalorder %s716_s3, %s482_s6  ;;  %p484_p2 = pneg %p689_p0 }
  0x2b   : > { %s487_s8 = scalar_lea.hbm %s828_s1, 192  ;;  %p488_p10 = scmp.lt.u32.totalorder %s716_s3, %s828_s1 }
  0x2c   : > { %p485_p4 = pnand %p484_p2, %p483_p12  ;;  %p489_p11 = scmp.lt.u32.totalorder %s487_s8, %s482_s6 }
  0x2d   : > { %p491_p1 = scmp.lt.u32.totalorder %s482_s6, %s716_s3 }
  0x2e   : > { %p486_p6 = pneg %p485_p4  ;;  %p490_p5 = por %p489_p11, %p488_p10 }
  0x30   : > { %p492_p7 = por %p491_p1, %p490_p5 }
  0x32   : > { %p493_p9 = pnand %p492_p7, %p486_p6 }
  0x34   : > { %496 = shalt.err (!%p493_p9)
}
  0x35   : > { %s497_s17 = scalar_lea.vmem %s718_s28, 96  ;;  %s601_s23 = smov [#allocation6]  }
  0x36   : > { %p498_p12 = scmp.ne.s32.totalorder %s718_s28, %s497_s17  ;;  %s502_s27 = sshll.u32 %s601_s23, 4  ;;  %s503_s27 = int_to_ptr.vmem [resolvable:$false] %s502_s27 }
  0x37   : > { %s504_s29 = scalar_lea.vmem %s503_s27, 192  ;;  %p505_p3 = scmp.lt.s32.totalorder %s718_s28, %s503_s27 }
  0x38   : > { %p500_p4 = pnand %p498_p12, %p484_p2  ;;  %p506_p10 = scmp.lt.s32.totalorder %s504_s29, %s497_s17 }
  0x3a   : > { %p501_p8 = pneg %p500_p4  ;;  %p507_p11 = por %p506_p10, %p505_p3 }
  0x3c   : > { %p508_p5 = pnand %p507_p11, %p501_p8 }
  0x3e   : > { %511 = shalt.err (!%p508_p5)
}
  0x3f   : > { %s602_s30 = smov 32   ;;  %s603_s6 = smov 2  }
  0x40   : > { %407 = dma.hbm_to_vmem [thread:$0]  (!%p689_p0), %s716_s3, 96, %s718_s28, %s725_s5, %s602_s30, %s602_s30, %s603_s6  }
  0x41   : > { %159 = sbr.rel (%p681_p13) target bundleno = 116 (0x74), region = 28  ;;  %p840_p9 = scmp.ne.s32.totalorder (!%p681_p13), %s834_s18, 0 }
  0x48   : > { %565 = dma.done.wait (%p840_p9), [#allocation5], 64  }
  0x49   : > { %567 = vsyncadd (%p840_p9), [#allocation5], 4294967232  ;;  %s760_s26 = sand.u32 1, %s582_s10   ;;  %p841_p3 = scmp.ne.s32.totalorder %s835_s19, 0 }
  0x4a   : > { %s390_s7 = smul.u32 6, %s760_s26  ;;  %s166_s8 = scalar_lea.sflag [#allocation3], %s760_s26 }
  0x4c   : > { %s169_s24 = scalar_lea.vmem [#allocation6], %s390_s7 }
  0x4d   : > { %569 = dma.done.wait (%p841_p3), %s166_s8, 96  }
  0x4e   : > { %571 = vsyncadd (%p841_p3), %s166_s8, 4294967200 }
  0x4f   : > { %174 = sfence }
  0x50   : > { %s191_s22 = sld [smem:[#allocation2]]  ;;  %s366_s18 = sld [smem:[#allocation2 + $0x1]]  ;;  %v200_v0 = vld [vmem:[%s169_s24] sm:$0x3]  ;;  %v374_v1 = vld [vmem:[%s169_s24 + $0x2] sm:$0x3] }
  0x51   : > { %s367_s28 = sld [smem:[#allocation2 + $0x2]]  ;;  %s368_s3 = sld [smem:[#allocation2 + $0x80]]  ;;  %v375_v2 = vld [vmem:[%s169_s24 + $0x4] sm:$0x3]  ;;  %v216_v4 = vld [vmem:[%s169_s24] sm:$0x3] }
  0x52   : > { %s369_s5 = sld [smem:[#allocation2 + $0x81]]  ;;  %s370_s15 = sld [smem:[#allocation2 + $0x82]]  ;;  %v377_v8 = vld [vmem:[%s169_s24 + $0x2] sm:$0x3]  ;;  %v378_v12 = vld [vmem:[%s169_s24 + $0x4] sm:$0x3] }
  0x53   : > { %s371_s16 = sld [smem:[#allocation2 + $0x100]]  ;;  %s372_s17 = sld [smem:[#allocation2 + $0x101]]  ;;  %v231_v13 = vld [vmem:[%s169_s24] sm:$0x3]  ;;  %v381_v16 = vld [vmem:[%s169_s24 + $0x2] sm:$0x3] }
  0x54   : > { %s373_s23 = sld [smem:[#allocation2 + $0x102]]  ;;  %v382_v17 = vld [vmem:[%s169_s24 + $0x4] sm:$0x3]  ;;  %s190_s19 = scalar_lea.vmem [#allocation7], %s390_s7 }
  0x55   : > { %s261_s27 = sshll.u32 %s190_s19, 4  ;;  %s391_s29 = smul.u32 96, %s590_s12  ;;  %s773_s27 = int_to_ptr.vmem [resolvable:$true] %s261_s27 }
  0x56   : > { %v201_v3 = vstv %s191_s22  ;;  %v205_v6 = vstv %s366_s18  ;;  %s247_s8 = scalar_lea.sflag [#allocation4], %s760_s26  ;;  %s512_s24 = scalar_lea.vmem %s773_s27, 96 }
  0x57   : > { %v202_v5 = vmul.f32 %v201_v3, %v200_v0  ;;  %v210_v7 = vstv %s367_s28  ;;  %v206_v9 = vmul.f32 %v374_v1, %v205_v6  ;;  %v217_v11 = vstv %s368_s3  ;;  %s778_s7 = scalar_lea.hbm %s829_s2, %s391_s29  ;;  %p513_p8 = scmp.ne.s32.totalorder %s773_s27, %s512_s24 }
  0x58   : > { %v211_v10 = vmul.f32 %v375_v2, %v210_v7  ;;  %v218_v14 = vmul.f32 %v217_v11, %v216_v4  ;;  %v220_v15 = vstv %s369_s5  ;;  %v224_v20 = vstv %s370_s15  ;;  %p842_p13 = scmp.ne.s32.totalorder %s836_s20, 0  ;;  %s604_s12 = smov [#allocation7]  }
  0x59   : > { %v207_v18 = vadd.f32 %v206_v9, %v202_v5  ;;  %v221_v19 = vmul.f32 %v377_v8, %v220_v15  ;;  %v232_v21 = vstv %s371_s16  ;;  %v225_v22 = vmul.f32 %v378_v12, %v224_v20  ;;  %s516_s22 = sshll.u32 %s604_s12, 4  ;;  %s517_s22 = int_to_ptr.vmem [resolvable:$false] %s516_s22 }
  0x5a   : > { %v233_v23 = vmul.f32 %v232_v21, %v231_v13  ;;  %v235_v24 = vstv %s372_s17  ;;  %v239_v25 = vstv %s373_s23  ;;  %p514_p0 = pnand %p513_p8, %p842_p13  ;;  %s518_s18 = scalar_lea.vmem %s517_s22, 192 }
  0x5b   : > { %v212_v26 = vadd.f32 %v211_v10, %v207_v18  ;;  %v222_v27 = vadd.f32 %v221_v19, %v218_v14  ;;  %v236_v28 = vmul.f32 %v381_v16, %v235_v24  ;;  %v240_v29 = vmul.f32 %v382_v17, %v239_v25  ;;  %p519_p6 = scmp.lt.s32.totalorder %s773_s27, %s517_s22  ;;  %p520_p1 = scmp.lt.s32.totalorder %s518_s18, %s512_s24 }
  0x5c   : > { %p515_p2 = pneg %p514_p0 }
  0x5d   : > { %v376_v30 = vadd.f32 -0.5, %v212_v26  ;;  %v226_v31 = vadd.f32 %v225_v22, %v222_v27  ;;  %v237_v32 = vadd.f32 %v236_v28, %v233_v23  ;;  %p521_p7 = por %p520_p1, %p519_p6 }
  0x5f   : > { %v214_v33 = vmax.f32 %v376_v30, 0.0  ;;  %v379_v34 = vadd.f32 -0.5, %v226_v31  ;;  %v241_v35 = vadd.f32 %v240_v29, %v237_v32  ;;  %p522_p12 = pnand %p521_p7, %p515_p2 }
  0x61   : > { %215 = vst [vmem:[%s190_s19] sm:$0x3] %v214_v33  ;;  %v228_v36 = vmax.f32 %v379_v34, 0.0  ;;  %v383_v37 = vadd.f32 -0.5, %v241_v35 }
  0x63   : > { %380 = vst [vmem:[%s190_s19 + $0x2] sm:$0x3] %v228_v36  ;;  %v243_v38 = vmax.f32 %v383_v37, 0.0 }
  0x65   : > { %384 = vst [vmem:[%s190_s19 + $0x4] sm:$0x3] %v243_v38 }
  0x66   : > { %525 = shalt.err (!%p522_p12)
}
  0x67   : > { %s526_s28 = scalar_lea.hbm %s778_s7, 96  ;;  %s530_s15 = scalar_lea.hbm %s829_s2, 192 }
  0x68   : > { %p527_p4 = scmp.ne.s32.totalorder %s778_s7, %s526_s28  ;;  %p531_p5 = scmp.lt.u32.totalorder %s778_s7, %s829_s2 }
  0x69   : > { %p532_p9 = scmp.lt.u32.totalorder %s530_s15, %s526_s28  ;;  %p534_p8 = scmp.lt.u32.totalorder %s526_s28, %s778_s7 }
  0x6a   : > { %p528_p10 = pnand %p527_p4, %p842_p13 }
  0x6b   : > { %p533_p3 = por %p532_p9, %p531_p5 }
  0x6c   : > { %p529_p11 = pneg %p528_p10 }
  0x6d   : > { %p535_p0 = por %p534_p8, %p533_p3 }
  0x6f   : > { %p536_p2 = pnand %p535_p0, %p529_p11 }
  0x71   : > { %539 = shalt.err (!%p536_p2)
}
  0x72   : > { %s605_s23 = smov 32   ;;  %s606_s19 = smov 2  }
  0x73   : > { %398 = dma.vmem_to_hbm [thread:$0]  (%p842_p13), %s773_s27, 96, %s778_s7, %s247_s8, %s605_s23, %s605_s23, %s606_s19  }
  0x74 PF: > { %s276_s29 = sand.u32 1, %s578_s9   ;;  %p843_p6 = scmp.ne.s32.totalorder %s837_s21, 0 }
  0x75   : > { %p844_p1 = scmp.ge.s32.totalorder %s598_s14, 2  ;;  %s277_s30 = scalar_lea.sflag [#allocation4], %s276_s29 }
  0x77   : > { %p409_p7 = pnand %p844_p1, %p843_p6 }
  0x79   : > { %573 = dma.done.wait (!%p409_p7), %s277_s30, 96  }
  0x7a   : > { %575 = vsyncadd (!%p409_p7), %s277_s30, 4294967200  ;;  %s19_s14 = sadd.s32 1, %s598_s14   ;;  %s845_s9 = smov %s582_s10 }
  0x7b   : > { %p16_p12 = scmp.ge.s32.totalorder %s19_s14, 4   ;;  %s846_s10 = smov %s586_s11 }
  0x7c   : > { %s847_s11 = smov %s723_s4  ;;  %s848_s12 = smov %s594_s13 }
  0x7d   : > { %s849_s13 = smov %s851_s25  ;;  %18 = sbr.rel (!%p16_p12) target bundleno = 7 (0x7), region = 82 }
  0x84   :  { %282 = vsyncpa [#allocation3], 1 }
  0x85   :  { %284 = vsyncpa [#allocation3 + $0x1], 1 }
  0x86   :  { %285 = vsyncpa [#allocation4], 1 }
  0x87   :  { %287 = vsyncpa [#allocation4 + $0x1], 1 }
  0x88   :  { %288 = vsyncpa [#allocation5], 1 }
  0x89   :  { %290 = vsyncpa [#allocation5 + $0x1], 1 }

</bundles_post_ra>
